<compile_context>
chip_gen: v7x
topology: tpu7x:2x2x1
jax: 0.10.0
libtpu: 0.0.40
codegen_flags: <defaults>
</compile_context>

<pallas_src>
import jax
import jax.numpy as jnp
from jax import lax
from jax.experimental import pallas as pl
from jax.experimental.pallas import tpu as pltpu


_COMPUTE_DTYPE = jnp.bfloat16   # MXU-friendly operand dtype (f32 accumulation)
_BN_EPS = 1e-5


# ----------------------------------------------------------------------------
# Pallas kernel 1: lane-dense fused  relu(W @ A + shift)
#   W     : (Cout, Kd)   BN scale already folded in        (bf16)
#   A     : (Kd, tm)     im2col patches, M=B*OH*OW on lanes (bf16)
#   shift : (Cout, 1)    folded conv-bias + BN shift        (f32)
#   out   : (Cout, tm)   f32
# ----------------------------------------------------------------------------
def _matmul_shift_relu_kernel(w_ref, a_ref, shift_ref, o_ref):
    acc = jnp.dot(w_ref[...], a_ref[...], preferred_element_type=jnp.float32)
    acc = acc + shift_ref[...]
    o_ref[...] = jnp.maximum(acc, 0.0).astype(o_ref.dtype)


def _m_tiling(M, max_tm=2048):
    """Lane-multiple M tiles; >=2 grid steps so both v7x TensorCores get work."""
    num = max(2, -(-M // max_tm))
    tm = -(-M // (num * 128)) * 128
    return tm, num, tm * num


def fused_matmul_shift_relu(w_mat, a, shift):
    Cout, Kd = w_mat.shape
    Kd2, M = a.shape
    assert Kd == Kd2
    tm, num_m, Mp = _m_tiling(M)
    if Mp != M:                                    # pad only when needed
        a = jnp.pad(a, ((0, 0), (0, Mp - M)))
    shift2 = shift.reshape(Cout, 1).astype(jnp.float32)

    out = pl.pallas_call(
        _matmul_shift_relu_kernel,
        out_shape=jax.ShapeDtypeStruct((Cout, Mp), jnp.float32),
        grid_spec=pltpu.PrefetchScalarGridSpec(
            num_scalar_prefetch=0,
            grid=(num_m,),
            in_specs=[
                pl.BlockSpec((Cout, Kd), lambda i: (0, 0)),
                pl.BlockSpec((Kd, tm), lambda i: (0, i)),
                pl.BlockSpec((Cout, 1), lambda i: (0, 0)),
            ],
            out_specs=pl.BlockSpec((Cout, tm), lambda i: (0, i)),
        ),
        compiler_params=pltpu.CompilerParams(
            dimension_semantics=("parallel",),
            vmem_limit_bytes=32 * 1024 * 1024,
        ),
    )(w_mat, a, shift2)
    if Mp != M:
        out = out[:, :M]
    return out


# ----------------------------------------------------------------------------
# One Conv_Bn_ReLu block in (C, B, H, W) layout (valid conv, stride 1)
# ----------------------------------------------------------------------------
def conv_bn_relu_cbhw(x_cbhw, weight, bias, gamma, beta, mean, var,
                      eps=_BN_EPS):
    Cin, B, H, W = x_cbhw.shape
    Cout, Cin_w, K, _ = weight.shape
    assert Cin == Cin_w
    OH, OW = H - K + 1, W - K + 1
    Kd, M = Cin * K * K, B * OH * OW

    # im2col (XLA glue on small tensors): rows ordered (ci, kh, kw),
    # columns ordered (b, oh, ow) — matches weight.reshape(Cout, Cin*K*K).
    cols = [x_cbhw[:, :, kh:kh + OH, kw:kw + OW]
            for kh in range(K) for kw in range(K)]
    a = jnp.stack(cols, axis=1).reshape(Kd, M).astype(_COMPUTE_DTYPE)

    # Fold BN scale into the weight (host side); keep only the shift in-kernel.
    s = gamma / jnp.sqrt(var + eps)
    w_mat = (weight.reshape(Cout, Kd) * s[:, None]).astype(_COMPUTE_DTYPE)
    shift = s * (bias - mean) + beta

    y = fused_matmul_shift_relu(w_mat, a, shift)        # (Cout, M) f32
    return y.reshape(Cout, B, OH, OW)                   # feeds next layer directly


# ----------------------------------------------------------------------------
# Pallas kernel 2: fused head  fc1 + ReLU + fc2 + log_softmax (single step)
# ----------------------------------------------------------------------------
def _head_kernel(x_ref, w1_ref, b1_ref, w2_ref, b2_ref, o_ref):
    h = jnp.dot(x_ref[...], w1_ref[...], preferred_element_type=jnp.float32)
    h = jnp.maximum(h + b1_ref[...], 0.0)                        # fc1 + ReLU
    z = jnp.dot(h, w2_ref[...], preferred_element_type=jnp.float32)
    z = z + b2_ref[...]                                          # fc2
    m = jnp.max(z, axis=-1, keepdims=True)                       # log_softmax
    lse = m + jnp.log(jnp.sum(jnp.exp(z - m), axis=-1, keepdims=True))
    o_ref[...] = (z - lse).astype(o_ref.dtype)


def head_fc_relu_fc_logsoftmax(feat, fc1_w, fc1_b, fc2_w, fc2_b):
    B, F = feat.shape
    H1 = fc1_w.shape[0]
    C = fc2_w.shape[0]
    return pl.pallas_call(
        _head_kernel,
        out_shape=jax.ShapeDtypeStruct((B, C), jnp.float32),
        grid_spec=pltpu.PrefetchScalarGridSpec(
            num_scalar_prefetch=0,
            grid=(1,),
            in_specs=[
                pl.BlockSpec((B, F), lambda i: (0, 0)),
                pl.BlockSpec((F, H1), lambda i: (0, 0)),
                pl.BlockSpec((1, H1), lambda i: (0, 0)),
                pl.BlockSpec((H1, C), lambda i: (0, 0)),
                pl.BlockSpec((1, C), lambda i: (0, 0)),
            ],
            out_specs=pl.BlockSpec((B, C), lambda i: (0, 0)),
        ),
        compiler_params=pltpu.CompilerParams(
            dimension_semantics=("arbitrary",),
        ),
    )(feat, fc1_w.T, fc1_b.reshape(1, H1), fc2_w.T, fc2_b.reshape(1, C))


# ----------------------------------------------------------------------------
# Full forward pass
# ----------------------------------------------------------------------------
def simnet_cnn_allsize_ver4_forward(x_nchw, params):
    # single small layout transpose up front; conv stack then runs lane-dense
    h = jnp.transpose(x_nchw, (1, 0, 2, 3))                      # (Cin, B, H, W)
    for p in params["convs"]:
        h = conv_bn_relu_cbhw(h, p["weight"], p["bias"], p["gamma"],
                              p["beta"], p["mean"], p["var"])
    C, B, OH, OW = h.shape
    feat = jnp.transpose(h, (1, 0, 2, 3)).reshape(B, C * OH * OW)  # Flatten (NCHW order)
    # TODO(synk): Dropout layers are eval-mode identity here.
    return head_fc_relu_fc_logsoftmax(feat, params["fc1_w"], params["fc1_b"],
                                      params["fc2_w"], params["fc2_b"])


# ----------------------------------------------------------------------------
# Pure-JAX (XLA) reference of the same forward pass
# ----------------------------------------------------------------------------
def reference_forward(x_nchw, params, eps=_BN_EPS):
    h = x_nchw
    for p in params["convs"]:
        h = lax.conv_general_dilated(
            h, p["weight"], window_strides=(1, 1), padding="VALID",
            dimension_numbers=("NCHW", "OIHW", "NCHW"))
        h = h + p["bias"][None, :, None, None]
        s = p["gamma"] / jnp.sqrt(p["var"] + eps)
        h = (s[None, :, None, None] * (h - p["mean"][None, :, None, None])
             + p["beta"][None, :, None, None])
        h = jnp.maximum(h, 0.0)
    feat = h.reshape(h.shape[0], -1)
    z1 = jnp.maximum(feat @ params["fc1_w"].T + params["fc1_b"], 0.0)
    z2 = z1 @ params["fc2_w"].T + params["fc2_b"]
    return jax.nn.log_softmax(z2, axis=1)


# ----------------------------------------------------------------------------
# Deterministic parameter construction + run
# ----------------------------------------------------------------------------
def build_params(key, cfg):
    params = {"convs": []}
    cin = cfg["input_channel"]
    kd = key
    for i in range(cfg["cnn_layer_num"]):
        cout = cfg["output_channel_list"][i]
        K = cfg["kernel_size_list"][i]
        kd, kw, kb = jax.random.split(kd, 3)
        params["convs"].append(dict(
            weight=(0.1 * jax.random.normal(kw, (cout, cin, K, K))
                    ).astype(jnp.float32),
            bias=(0.01 * jax.random.normal(kb, (cout,))).astype(jnp.float32),
            gamma=1.0 + 0.05 * jnp.arange(cout, dtype=jnp.float32),
            beta=0.01 * jnp.arange(cout, dtype=jnp.float32),
            mean=jnp.zeros((cout,), jnp.float32),   # BN running_mean (init)
            var=jnp.ones((cout,), jnp.float32),     # BN running_var (init)
        ))
        cin = cout
    h, w = cfg["in_height"], cfg["in_width"]
    for K in cfg["kernel_size_list"]:
        h, w = h - K + 1, w - K + 1
    feat = cin * h * w
    kd, k1, k2, k3, k4 = jax.random.split(kd, 5)
    params["fc1_w"] = (0.05 * jax.random.normal(
        k1, (cfg["linear2_in"], feat))).astype(jnp.float32)
    params["fc1_b"] = (0.01 * jax.random.normal(
        k2, (cfg["linear2_in"],))).astype(jnp.float32)
    params["fc2_w"] = (0.05 * jax.random.normal(
        k3, (cfg["classes"], cfg["linear2_in"]))).astype(jnp.float32)
    params["fc2_b"] = (0.01 * jax.random.normal(
        k4, (cfg["classes"],))).astype(jnp.float32)
    return params


if __name__ == "__main__":
    cfg = dict(
        cnn_layer_num=2,
        input_channel=4,
        in_height=16,
        in_width=16,
        output_channel_list=[8, 8],
        kernel_size_list=[3, 3],
        classes=10,
        drop=0.5,
        linear2_in=32,
    )
    B = 2

    key = jax.random.PRNGKey(0)
    kx, kp = jax.random.split(key)
    x = jax.random.normal(
        kx, (B, cfg["input_channel"], cfg["in_height"], cfg["in_width"]),
        dtype=jnp.float32)
    params = build_params(kp, cfg)

    fwd = jax.jit(simnet_cnn_allsize_ver4_forward)
    out = jax.block_until_ready(fwd(x, params))

    assert out.shape == (B, cfg["classes"]), out.shape
    assert bool(jnp.all(jnp.isfinite(out)))
    # log_softmax rows must exponentiate to probability distributions
    assert bool(jnp.allclose(jnp.sum(jnp.exp(out), axis=1), 1.0, atol=1e-3))
    # compare against the pure-JAX reference (loose tol for bf16 MXU operands)
    ref = reference_forward(x, params)
    max_err = float(jnp.max(jnp.abs(out - ref)))
    assert max_err < 5e-2, f"max |pallas - ref| = {max_err}"
    print("KERNEL_OK")
</pallas_src>

<mosaic_0001>
module attributes {stable_mosaic.version = 11 : i64} {
  func.func @_matmul_shift_relu_kernel(%arg0: i32, %arg1: memref<8x36xbf16, #tpu.memory_space<vmem>>, %arg2: memref<36x256xbf16, #tpu.memory_space<vmem>>, %arg3: memref<8x1xf32, #tpu.memory_space<vmem>>, %arg4: memref<8x256xf32, #tpu.memory_space<vmem>>) attributes {dimension_semantics = [#tpu.dimension_semantics<parallel>], iteration_bounds = array<i64: 2>, scalar_prefetch = 0 : i64, scratch_operands = 0 : i64, tpu.core_type = #tpu.core_type<tc>, window_params = [{pipeline_mode = #tpu.pipeline_mode<synchronous>, transform_indices = @transform_0, window_bounds = array<i64: 8, 36>}, {transform_indices = @transform_1, window_bounds = array<i64: 36, 256>}, {pipeline_mode = #tpu.pipeline_mode<synchronous>, transform_indices = @transform_2, window_bounds = array<i64: 8, 1>}, {transform_indices = @transform_3, window_bounds = array<i64: 8, 256>}]} {
    %c0 = arith.constant 0 : index
    %c0_0 = arith.constant 0 : index
    %0 = vector.load %arg1[%c0, %c0_0] : memref<8x36xbf16, #tpu.memory_space<vmem>>, vector<8x36xbf16>
    %c0_1 = arith.constant 0 : index
    %c0_2 = arith.constant 0 : index
    %1 = vector.load %arg2[%c0_1, %c0_2] : memref<36x256xbf16, #tpu.memory_space<vmem>>, vector<36x256xbf16>
    %cst = arith.constant dense<0.000000e+00> : vector<8x256xf32>
    %2 = tpu.matmul %0, %1, %cst {dimension_numbers = #tpu.dot_dimension_numbers<[1], [0], [0], [1], [0, 0, 1, 1], [], []>} : vector<8x36xbf16>, vector<36x256xbf16>, vector<8x256xf32> -> vector<8x256xf32>
    %c0_3 = arith.constant 0 : index
    %c0_4 = arith.constant 0 : index
    %3 = vector.load %arg3[%c0_3, %c0_4] : memref<8x1xf32, #tpu.memory_space<vmem>>, vector<8x1xf32>
    %4 = vector.broadcast %3 : vector<8x1xf32> to vector<8x256xf32>
    %5 = arith.addf %2, %4 : vector<8x256xf32>
    %cst_5 = arith.constant 0.000000e+00 : f32
    %6 = vector.broadcast %cst_5 : f32 to vector<8x256xf32>
    %7 = arith.maximumf %5, %6 : vector<8x256xf32>
    %c0_6 = arith.constant 0 : index
    %c0_7 = arith.constant 0 : index
    %8 = vector.load %arg4[%c0_6, %c0_7] : memref<8x256xf32, #tpu.memory_space<vmem>>, vector<8x256xf32>
    tpu.vector_store %arg4[%c0_6, %c0_7], %7 {strides = array<i32>} : memref<8x256xf32, #tpu.memory_space<vmem>>, vector<8x256xf32>,
    return
  }
  func.func @transform_0(%arg0: i32) -> (i32, i32) {
    %c0_i32 = arith.constant 0 : i32
    %c0_i32_0 = arith.constant 0 : i32
    %c0_i32_1 = arith.constant 0 : i32
    return %c0_i32, %c0_i32_0 : i32, i32
  }
  func.func @transform_1(%arg0: i32) -> (i32, i32) {
    %c0_i32 = arith.constant 0 : i32
    %c0_i32_0 = arith.constant 0 : i32
    return %c0_i32, %arg0 : i32, i32
  }
  func.func @transform_2(%arg0: i32) -> (i32, i32) {
    %c0_i32 = arith.constant 0 : i32
    %c0_i32_0 = arith.constant 0 : i32
    %c0_i32_1 = arith.constant 0 : i32
    return %c0_i32, %c0_i32_0 : i32, i32
  }
  func.func @transform_3(%arg0: i32) -> (i32, i32) {
    %c0_i32 = arith.constant 0 : i32
    %c0_i32_0 = arith.constant 0 : i32
    return %c0_i32, %arg0 : i32, i32
  }
}

module attributes {stable_mosaic.version = 11 : i64} {
  func.func @_matmul_shift_relu_kernel(%arg0: i32, %arg1: memref<8x72xbf16, #tpu.memory_space<vmem>>, %arg2: memref<72x256xbf16, #tpu.memory_space<vmem>>, %arg3: memref<8x1xf32, #tpu.memory_space<vmem>>, %arg4: memref<8x256xf32, #tpu.memory_space<vmem>>) attributes {dimension_semantics = [#tpu.dimension_semantics<parallel>], iteration_bounds = array<i64: 2>, scalar_prefetch = 0 : i64, scratch_operands = 0 : i64, tpu.core_type = #tpu.core_type<tc>, window_params = [{pipeline_mode = #tpu.pipeline_mode<synchronous>, transform_indices = @transform_0, window_bounds = array<i64: 8, 72>}, {transform_indices = @transform_1, window_bounds = array<i64: 72, 256>}, {pipeline_mode = #tpu.pipeline_mode<synchronous>, transform_indices = @transform_2, window_bounds = array<i64: 8, 1>}, {transform_indices = @transform_3, window_bounds = array<i64: 8, 256>}]} {
    %c0 = arith.constant 0 : index
    %c0_0 = arith.constant 0 : index
    %0 = vector.load %arg1[%c0, %c0_0] : memref<8x72xbf16, #tpu.memory_space<vmem>>, vector<8x72xbf16>
    %c0_1 = arith.constant 0 : index
    %c0_2 = arith.constant 0 : index
    %1 = vector.load %arg2[%c0_1, %c0_2] : memref<72x256xbf16, #tpu.memory_space<vmem>>, vector<72x256xbf16>
    %cst = arith.constant dense<0.000000e+00> : vector<8x256xf32>
    %2 = tpu.matmul %0, %1, %cst {dimension_numbers = #tpu.dot_dimension_numbers<[1], [0], [0], [1], [0, 0, 1, 1], [], []>} : vector<8x72xbf16>, vector<72x256xbf16>, vector<8x256xf32> -> vector<8x256xf32>
    %c0_3 = arith.constant 0 : index
    %c0_4 = arith.constant 0 : index
    %3 = vector.load %arg3[%c0_3, %c0_4] : memref<8x1xf32, #tpu.memory_space<vmem>>, vector<8x1xf32>
    %4 = vector.broadcast %3 : vector<8x1xf32> to vector<8x256xf32>
    %5 = arith.addf %2, %4 : vector<8x256xf32>
    %cst_5 = arith.constant 0.000000e+00 : f32
    %6 = vector.broadcast %cst_5 : f32 to vector<8x256xf32>
    %7 = arith.maximumf %5, %6 : vector<8x256xf32>
    %c0_6 = arith.constant 0 : index
    %c0_7 = arith.constant 0 : index
    %8 = vector.load %arg4[%c0_6, %c0_7] : memref<8x256xf32, #tpu.memory_space<vmem>>, vector<8x256xf32>
    tpu.vector_store %arg4[%c0_6, %c0_7], %7 {strides = array<i32>} : memref<8x256xf32, #tpu.memory_space<vmem>>, vector<8x256xf32>,
    return
  }
  func.func @transform_0(%arg0: i32) -> (i32, i32) {
    %c0_i32 = arith.constant 0 : i32
    %c0_i32_0 = arith.constant 0 : i32
    %c0_i32_1 = arith.constant 0 : i32
    return %c0_i32, %c0_i32_0 : i32, i32
  }
  func.func @transform_1(%arg0: i32) -> (i32, i32) {
    %c0_i32 = arith.constant 0 : i32
    %c0_i32_0 = arith.constant 0 : i32
    return %c0_i32, %arg0 : i32, i32
  }
  func.func @transform_2(%arg0: i32) -> (i32, i32) {
    %c0_i32 = arith.constant 0 : i32
    %c0_i32_0 = arith.constant 0 : i32
    %c0_i32_1 = arith.constant 0 : i32
    return %c0_i32, %c0_i32_0 : i32, i32
  }
  func.func @transform_3(%arg0: i32) -> (i32, i32) {
    %c0_i32 = arith.constant 0 : i32
    %c0_i32_0 = arith.constant 0 : i32
    return %c0_i32, %arg0 : i32, i32
  }
}

module attributes {stable_mosaic.version = 11 : i64} {
  func.func @_head_kernel(%arg0: i32, %arg1: memref<2x1152xf32, #tpu.memory_space<vmem>>, %arg2: memref<1152x32xf32, #tpu.memory_space<vmem>>, %arg3: memref<1x32xf32, #tpu.memory_space<vmem>>, %arg4: memref<32x10xf32, #tpu.memory_space<vmem>>, %arg5: memref<1x10xf32, #tpu.memory_space<vmem>>, %arg6: memref<2x10xf32, #tpu.memory_space<vmem>>) attributes {dimension_semantics = [#tpu.dimension_semantics<arbitrary>], iteration_bounds = array<i64: 1>, scalar_prefetch = 0 : i64, scratch_operands = 0 : i64, tpu.core_type = #tpu.core_type<tc>, window_params = [{pipeline_mode = #tpu.pipeline_mode<synchronous>, transform_indices = @transform_0, window_bounds = array<i64: 2, 1152>}, {pipeline_mode = #tpu.pipeline_mode<synchronous>, transform_indices = @transform_1, window_bounds = array<i64: 1152, 32>}, {pipeline_mode = #tpu.pipeline_mode<synchronous>, transform_indices = @transform_2, window_bounds = array<i64: 1, 32>}, {pipeline_mode = #tpu.pipeline_mode<synchronous>, transform_indices = @transform_3, window_bounds = array<i64: 32, 10>}, {pipeline_mode = #tpu.pipeline_mode<synchronous>, transform_indices = @transform_4, window_bounds = array<i64: 1, 10>}, {pipeline_mode = #tpu.pipeline_mode<synchronous>, transform_indices = @transform_5, window_bounds = array<i64: 2, 10>}]} {
    %c0 = arith.constant 0 : index
    %c0_0 = arith.constant 0 : index
    %0 = vector.load %arg1[%c0, %c0_0] : memref<2x1152xf32, #tpu.memory_space<vmem>>, vector<2x1152xf32>
    %c0_1 = arith.constant 0 : index
    %c0_2 = arith.constant 0 : index
    %1 = vector.load %arg2[%c0_1, %c0_2] : memref<1152x32xf32, #tpu.memory_space<vmem>>, vector<1152x32xf32>
    %cst = arith.constant dense<0.000000e+00> : vector<2x32xf32>
    %2 = tpu.matmul %0, %1, %cst {dimension_numbers = #tpu.dot_dimension_numbers<[1], [0], [0], [1], [0, 0, 1, 1], [], []>} : vector<2x1152xf32>, vector<1152x32xf32>, vector<2x32xf32> -> vector<2x32xf32>
    %c0_3 = arith.constant 0 : index
    %c0_4 = arith.constant 0 : index
    %3 = vector.load %arg3[%c0_3, %c0_4] : memref<1x32xf32, #tpu.memory_space<vmem>>, vector<1x32xf32>
    %4 = vector.broadcast %3 : vector<1x32xf32> to vector<2x32xf32>
    %5 = arith.addf %2, %4 : vector<2x32xf32>
    %cst_5 = arith.constant 0.000000e+00 : f32
    %6 = vector.broadcast %cst_5 : f32 to vector<2x32xf32>
    %7 = arith.maximumf %5, %6 : vector<2x32xf32>
    %c0_6 = arith.constant 0 : index
    %c0_7 = arith.constant 0 : index
    %8 = vector.load %arg4[%c0_6, %c0_7] : memref<32x10xf32, #tpu.memory_space<vmem>>, vector<32x10xf32>
    %cst_8 = arith.constant dense<0.000000e+00> : vector<2x10xf32>
    %9 = tpu.matmul %7, %8, %cst_8 {dimension_numbers = #tpu.dot_dimension_numbers<[1], [0], [0], [1], [0, 0, 1, 1], [], []>} : vector<2x32xf32>, vector<32x10xf32>, vector<2x10xf32> -> vector<2x10xf32>
    %c0_9 = arith.constant 0 : index
    %c0_10 = arith.constant 0 : index
    %10 = vector.load %arg5[%c0_9, %c0_10] : memref<1x10xf32, #tpu.memory_space<vmem>>, vector<1x10xf32>
    %11 = vector.broadcast %10 : vector<1x10xf32> to vector<2x10xf32>
    %12 = arith.addf %9, %11 : vector<2x10xf32>
    %cst_11 = arith.constant dense<0xFF800000> : vector<2xf32>
    %13 = vector.multi_reduction <maximumf>, %12, %cst_11 [1] : vector<2x10xf32> to vector<2xf32>
    %14 = vector.shape_cast %13 : vector<2xf32> to vector<2x1xf32>
    %15 = vector.broadcast %14 : vector<2x1xf32> to vector<2x10xf32>
    %16 = arith.subf %12, %15 : vector<2x10xf32>
    %17 = math.exp %16 : vector<2x10xf32>
    %cst_12 = arith.constant dense<0.000000e+00> : vector<2xf32>
    %18 = vector.multi_reduction <add>, %17, %cst_12 [1] : vector<2x10xf32> to vector<2xf32>
    %19 = vector.shape_cast %18 : vector<2xf32> to vector<2x1xf32>
    %20 = math.log %19 : vector<2x1xf32>
    %21 = arith.addf %14, %20 : vector<2x1xf32>
    %22 = vector.broadcast %21 : vector<2x1xf32> to vector<2x10xf32>
    %23 = arith.subf %12, %22 : vector<2x10xf32>
    %c0_13 = arith.constant 0 : index
    %c0_14 = arith.constant 0 : index
    %24 = vector.load %arg6[%c0_13, %c0_14] : memref<2x10xf32, #tpu.memory_space<vmem>>, vector<2x10xf32>
    tpu.vector_store %arg6[%c0_13, %c0_14], %23 {strides = array<i32>} : memref<2x10xf32, #tpu.memory_space<vmem>>, vector<2x10xf32>,
    return
  }
  func.func @transform_0(%arg0: i32) -> (i32, i32) {
    %c0_i32 = arith.constant 0 : i32
    %c0_i32_0 = arith.constant 0 : i32
    %c0_i32_1 = arith.constant 0 : i32
    return %c0_i32, %c0_i32_0 : i32, i32
  }
  func.func @transform_1(%arg0: i32) -> (i32, i32) {
    %c0_i32 = arith.constant 0 : i32
    %c0_i32_0 = arith.constant 0 : i32
    %c0_i32_1 = arith.constant 0 : i32
    return %c0_i32, %c0_i32_0 : i32, i32
  }
  func.func @transform_2(%arg0: i32) -> (i32, i32) {
    %c0_i32 = arith.constant 0 : i32
    %c0_i32_0 = arith.constant 0 : i32
    %c0_i32_1 = arith.constant 0 : i32
    return %c0_i32, %c0_i32_0 : i32, i32
  }
  func.func @transform_3(%arg0: i32) -> (i32, i32) {
    %c0_i32 = arith.constant 0 : i32
    %c0_i32_0 = arith.constant 0 : i32
    %c0_i32_1 = arith.constant 0 : i32
    return %c0_i32, %c0_i32_0 : i32, i32
  }
  func.func @transform_4(%arg0: i32) -> (i32, i32) {
    %c0_i32 = arith.constant 0 : i32
    %c0_i32_0 = arith.constant 0 : i32
    %c0_i32_1 = arith.constant 0 : i32
    return %c0_i32, %c0_i32_0 : i32, i32
  }
  func.func @transform_5(%arg0: i32) -> (i32, i32) {
    %c0_i32 = arith.constant 0 : i32
    %c0_i32_0 = arith.constant 0 : i32
    %c0_i32_1 = arith.constant 0 : i32
    return %c0_i32, %c0_i32_0 : i32, i32
  }
}

</mosaic_0001>

<bundles_post_ra>
// kernel: simnet_cnn_allsize_ver4_forward.3
= control target key start
LH: loop header
LB: loop body
LE: loop exit
PB: predicated region body
PF: predicated region fallthrough
CT: control target
= control target key end

     0   :  { %s481_s12 = smov 0   ;;  %s483_s13 = smov 0   ;;  %s539_s0 = inlined_call_operand.vmem [shape: bf16[8,36], index: 0, kind: input, shape index: {}]   ;;  %s540_s1 = inlined_call_operand.vmem [shape: bf16[36,512], index: 1, kind: input, shape index: {}]   ;;  %s541_s2 = inlined_call_operand.vmem [shape: f32[8,1], index: 2, kind: input, shape index: {}]   ;;  %s542_s3 = inlined_call_operand.vmem [shape: f32[8,512], index: 3, kind: output, shape index: {}]  }
   0x1   :  { %s485_s14 = smov 0  }
   0x2 LB: > { %s380_s15 = sadd.s32 4294967295, %s458_s14   ;;  %s498_s16 = sadd.s32 1, %s458_s14   ;;  %s458_s14 = sphi %s485_s14, %s545_s14   ;;  %s454_s13 = sphi %s483_s13, %s544_s13   ;;  %s450_s12 = sphi %s481_s12, %s543_s12  }
   0x3   : > { %s38_s17 = ssub.s32 %s458_s14, %s498_s16  ;;  %s41_s18 = sadd.s32 1, %s454_s13 }
   0x4   : > { %p39_p0 = scmp.eq.s32.totalorder %s38_s17, 0  ;;  %p48_p1 = scmp.ne.s32.totalorder %s454_s13, %s450_s12 }
   0x5   : > { %p49_p2 = scmp.eq.s32.totalorder %s458_s14, 0  ;;  %p383_p4 = scmp.ge.s32.totalorder %s458_s14, 2 }
   0x6   : > { %s507_s19 = scalar_select %p39_p0, %s454_s13, %s41_s18  }
   0x7   : > { %p50_p3 = por %p49_p2, %p48_p1  ;;  %127 = sbr.rel (%p383_p4) target bundleno = 21 (0x15), region = 24 }
   0xe   : > { %130 = sbr.rel (!%p50_p3) target bundleno = 21 (0x15), region = 28  ;;  %s132_s20 = sand.u32 (%p50_p3), 1, %s454_s13  }
   0xf   : > { %s399_s21 = sshll.u32 (%p50_p3), %s458_s14, 3  ;;  %s400_s22 = smul.u32 (%p50_p3), 40, %s132_s20 }
  0x10   : > { %s137_s25 = scalar_lea.vmem (%p50_p3), %s540_s1, %s399_s21 }
  0x11   : > { %v173_v0 = vld [vmem:[%s137_s25] sm:$0xff] (%p50_p3)  ;;  %v175_v1 = vld [vmem:[%s137_s25 + $0x10] sm:$0xff] (%p50_p3)  ;;  %s134_s26 = scalar_lea.vmem (%p50_p3), [#allocation2], %s400_s22 }
  0x12   : > { %v177_v2 = vld [vmem:[%s137_s25 + $0x20] sm:$0xff] (%p50_p3)  ;;  %v179_v3 = vld [vmem:[%s137_s25 + $0x30] sm:$0xff] (%p50_p3)  ;;  %174 = vst [vmem:[%s134_s26] sm:$0xff] (%p50_p3), %v173_v0  ;;  %176 = vst [vmem:[%s134_s26 + $0x8] sm:$0xff] (%p50_p3), %v175_v1 }
  0x13   : > { %v181_v4 = vld [vmem:[%s137_s25 + $0x40] sm:$0xff] (%p50_p3)  ;;  %178 = vst [vmem:[%s134_s26 + $0x10] sm:$0xff] (%p50_p3), %v177_v2  ;;  %180 = vst [vmem:[%s134_s26 + $0x18] sm:$0xff] (%p50_p3), %v179_v3 }
  0x14   : > { %182 = vst [vmem:[%s134_s26 + $0x20] sm:$0xff] (%p50_p3), %v181_v4 }
  0x15 PF: > { %p386_p5 = scmp.ge.s32.totalorder %s458_s14, 1  ;;  %p187_p6 = scmp.lt.s32.totalorder %s458_s14, 3 }
  0x17   : > { %p188_p7 = pnand %p386_p5, %p187_p6 }
  0x18   : > { %s194_s27 = sand.u32 (!%p188_p7), 1, %s450_s12   ;;  %v460_v5 = vmov (!%p188_p7), 0   ;;  %v231_v6 = vld [vmem:[%s541_s2] sm:$0xff] (!%p188_p7)  ;;  %vm266_vm0 = vcmask (!%p188_p7), 1041408   ;;  %vm262_vm1 = vcmask (!%p188_p7), 293888   ;;  %s387_s7 = sshll.u32 (!%p188_p7), %s380_s15, 1 }
  0x19   : > { %191 = sbr.rel (%p188_p7) target bundleno = 260 (0x104), region = 66  ;;  %305 = vmatprep.mubr.bf16.mxu0 (!%p188_p7), %v460_v5  ;;  %427 = vset.pattern.permute.xlu0 (!%p188_p7), %v460_v5  ;;  %v225_v15 = vld [vmem:[%s539_s0] sm:$0xf] (!%p188_p7)  ;;  %p219_p8 = scmp.lt.s32.totalorder (!%p188_p7), %s387_s7, 3 }
  0x1a   : > { %s401_s28 = smul.u32 (!%p188_p7), 40, %s194_s27  ;;  %234 = vperm.xlu0 (!%p188_p7), %427, %v231_v6  }
  0x1c   : > { %s196_s4 = scalar_lea.vmem (!%p188_p7), [#allocation2], %s401_s28 }
  0x1d   : > { %v428_v7 = vld [vmem:[%s196_s4 + $0x4] ss:$8 sps:$4 sm:$0xff] (!%p188_p7)   ;;  %v430_v8 = vld [vmem:[%s196_s4] ss:$8 sps:$4 sm:$0xff] (!%p188_p7)   ;;  %v431_v9 = vld [vmem:[%s196_s4 + $0x14] ss:$8 sps:$4 sm:$0xff] (!%p188_p7)  }
  0x1e   : > { %273 = vmatprep.subr.bf16.mxu0 (!%p188_p7), %v428_v7  ;;  %v230_v10 = vld [vmem:[%s196_s4 + $0x20] sm:$0x33] (!%p188_p7)  ;;  %v433_v11 = vld [vmem:[%s196_s4 + $0x10] ss:$8 sps:$4 sm:$0xff] (!%p188_p7)  }
  0x1f   : > { %274 = vmatpush1.bf16.msra.mxu0 (!%p188_p7), %v430_v8  ;;  %v394_v12 = vcombine.high (!%p188_p7), %v230_v10, %v230_v10  ;;  %v393_v13 = vcombine.low (!%p188_p7), %v230_v10, %v230_v10 }
  0x20   : > { %275 = vmatprep.subr.bf16.mxu0 %v431_v9  ;;  %s547_s7 = smov (!%p219_p8, %s387_s7), 3 }
  0x21   : > { %v268_v14 = vsel %vm266_vm0, %v393_v13, 0  ;;  %s388_s8 = sshll.u32 %s547_s7, 3 }
  0x22   : > { %s222_s11 = scalar_lea.vmem %s542_s3, %s388_s8 }
  0x23   : > { %276 = vmatpush1.bf16.msra.mxu0 %v433_v11 }
  0x24   : > { %395 = vmatprep.subr.msk.bf16.mxu0 %vm266_vm0, %v394_v12 }
  0x27   : > { %278 = vmatpush1.bf16.msra.mxu0 %v268_v14 }
  0x2a   : > { %396 = vmatmul.mubr.msk.bf16.vlgmr.msra.gmra.mrb[0].mxu0 %vm262_vm1, %v225_v15 }
  0x99   : > { %v235_v16 = vpop.permute.xlu0 %234 }
  0xfd   : > { %v307_v17 = vpop.f32.mrb[0].mxu0 }
  0xfe   : > { %v308_v18 = vadd.f32 %v307_v17, %v235_v16  ;;  %v309_v19 = vpop.f32.mrb[1].mxu0 }
  0xff   : > { %v310_v20 = vadd.f32 %v309_v19, %v235_v16  ;;  %v311_v21 = vpop.f32.mrb[2].mxu0 }
 0x100   : > { %v314_v22 = vmax.f32 %v308_v18, 0.0  ;;  %v312_v23 = vpop.f32.mrb[3].mxu0 }
 0x101   : > { %v315_v24 = vmax.f32 %v310_v20, 0.0 }
 0x102   : > { %316 = vst [vmem:[%s222_s11] sm:$0xff] %v314_v22 }
 0x103   : > { %317 = vst [vmem:[%s222_s11 + $0x8] sm:$0xff] %v315_v24 }
 0x104 PF: > { %p10_p9 = scmp.ge.s32.totalorder %s498_s16, 4   ;;  %s543_s12 = smov %s454_s13 }
 0x105   : > { %s544_s13 = smov %s507_s19  ;;  %s545_s14 = smov %s498_s16 }
 0x106   :  { %12 = sbr.rel (!%p10_p9) target bundleno = 2 (0x2), region = 105 }

// kernel: simnet_cnn_allsize_ver4_forward.4
= control target key start
LH: loop header
LB: loop body
LE: loop exit
PB: predicated region body
PF: predicated region fallthrough
CT: control target
= control target key end

     0   :  { %s531_s12 = smov 0   ;;  %s533_s13 = smov 0   ;;  %s589_s0 = inlined_call_operand.vmem [shape: bf16[8,72], index: 0, kind: input, shape index: {}]   ;;  %s590_s1 = inlined_call_operand.vmem [shape: bf16[72,512], index: 1, kind: input, shape index: {}]   ;;  %s591_s2 = inlined_call_operand.vmem [shape: f32[8,1], index: 2, kind: input, shape index: {}]   ;;  %s592_s3 = inlined_call_operand.vmem [shape: f32[8,512], index: 3, kind: output, shape index: {}]  }
   0x1   :  { %s535_s14 = smov 0  }
   0x2 LB: > { %s420_s15 = sadd.s32 4294967295, %s508_s14   ;;  %s548_s16 = sadd.s32 1, %s508_s14   ;;  %s508_s14 = sphi %s535_s14, %s595_s14   ;;  %s504_s13 = sphi %s533_s13, %s594_s13   ;;  %s500_s12 = sphi %s531_s12, %s593_s12  }
   0x3   : > { %s38_s17 = ssub.s32 %s508_s14, %s548_s16  ;;  %s41_s18 = sadd.s32 1, %s504_s13 }
   0x4   : > { %p39_p0 = scmp.eq.s32.totalorder %s38_s17, 0  ;;  %p48_p1 = scmp.ne.s32.totalorder %s504_s13, %s500_s12 }
   0x5   : > { %p49_p2 = scmp.eq.s32.totalorder %s508_s14, 0  ;;  %p423_p4 = scmp.ge.s32.totalorder %s508_s14, 2 }
   0x6   : > { %s557_s19 = scalar_select %p39_p0, %s504_s13, %s41_s18  }
   0x7   : > { %p50_p3 = por %p49_p2, %p48_p1  ;;  %127 = sbr.rel (%p423_p4) target bundleno = 23 (0x17), region = 24 }
   0xe   : > { %130 = sbr.rel (!%p50_p3) target bundleno = 23 (0x17), region = 28  ;;  %s132_s20 = sand.u32 (%p50_p3), 1, %s504_s13  }
   0xf   : > { %s443_s21 = sshll.u32 (%p50_p3), %s508_s14, 3  ;;  %s444_s22 = smul.u32 (%p50_p3), 72, %s132_s20 }
  0x10   : > { %s137_s25 = scalar_lea.vmem (%p50_p3), %s590_s1, %s443_s21 }
  0x11   : > { %v181_v0 = vld [vmem:[%s137_s25] sm:$0xff] (%p50_p3)  ;;  %v183_v1 = vld [vmem:[%s137_s25 + $0x10] sm:$0xff] (%p50_p3)  ;;  %s134_s26 = scalar_lea.vmem (%p50_p3), [#allocation2], %s444_s22 }
  0x12   : > { %v185_v2 = vld [vmem:[%s137_s25 + $0x20] sm:$0xff] (%p50_p3)  ;;  %v187_v3 = vld [vmem:[%s137_s25 + $0x30] sm:$0xff] (%p50_p3)  ;;  %182 = vst [vmem:[%s134_s26] sm:$0xff] (%p50_p3), %v181_v0  ;;  %184 = vst [vmem:[%s134_s26 + $0x8] sm:$0xff] (%p50_p3), %v183_v1 }
  0x13   : > { %v189_v4 = vld [vmem:[%s137_s25 + $0x40] sm:$0xff] (%p50_p3)  ;;  %v191_v5 = vld [vmem:[%s137_s25 + $0x50] sm:$0xff] (%p50_p3)  ;;  %186 = vst [vmem:[%s134_s26 + $0x10] sm:$0xff] (%p50_p3), %v185_v2  ;;  %188 = vst [vmem:[%s134_s26 + $0x18] sm:$0xff] (%p50_p3), %v187_v3 }
  0x14   : > { %190 = vst [vmem:[%s134_s26 + $0x20] sm:$0xff] (%p50_p3), %v189_v4  ;;  %192 = vst [vmem:[%s134_s26 + $0x28] sm:$0xff] (%p50_p3), %v191_v5  ;;  %v193_v6 = vld [vmem:[%s137_s25 + $0x60] sm:$0xff] (%p50_p3)  ;;  %v195_v7 = vld [vmem:[%s137_s25 + $0x70] sm:$0xff] (%p50_p3) }
  0x15   : > { %v197_v8 = vld [vmem:[%s137_s25 + $0x80] sm:$0xff]  ;;  %194 = vst [vmem:[%s134_s26 + $0x30] sm:$0xff] %v193_v6  ;;  %196 = vst [vmem:[%s134_s26 + $0x38] sm:$0xff] %v195_v7 }
  0x16   : > { %198 = vst [vmem:[%s134_s26 + $0x40] sm:$0xff] %v197_v8 }
  0x17 PF: > { %p426_p5 = scmp.ge.s32.totalorder %s508_s14, 1  ;;  %p203_p6 = scmp.lt.s32.totalorder %s508_s14, 3 }
  0x19   : > { %p204_p7 = pnand %p426_p5, %p203_p6 }
  0x1a   : > { %s210_s27 = sand.u32 (!%p204_p7), 1, %s500_s12   ;;  %v510_v9 = vmov (!%p204_p7), 0   ;;  %v251_v10 = vld [vmem:[%s591_s2] sm:$0xff] (!%p204_p7)  ;;  %vm306_vm0 = vcmask (!%p204_p7), 1043456   ;;  %vm302_vm1 = vcmask (!%p204_p7), 588800   ;;  %s427_s7 = sshll.u32 (!%p204_p7), %s420_s15, 1 }
  0x1b   : > { %207 = sbr.rel (%p204_p7) target bundleno = 270 (0x10e), region = 66  ;;  %345 = vmatprep.mubr.bf16.mxu0 (!%p204_p7), %v510_v9  ;;  %471 = vset.pattern.permute.xlu0 (!%p204_p7), %v510_v9  ;;  %v241_v23 = vld [vmem:[%s589_s0] sm:$0xf] (!%p204_p7)  ;;  %p235_p8 = scmp.lt.s32.totalorder (!%p204_p7), %s427_s7, 3 }
  0x1c   : > { %s445_s28 = smul.u32 (!%p204_p7), 72, %s210_s27  ;;  %254 = vperm.xlu0 (!%p204_p7), %471, %v251_v10  }
  0x1e   : > { %s212_s4 = scalar_lea.vmem (!%p204_p7), [#allocation2], %s445_s28 }
  0x1f   : > { %v472_v11 = vld [vmem:[%s212_s4 + $0x4] ss:$8 sps:$4 sm:$0xff] (!%p204_p7)   ;;  %v474_v12 = vld [vmem:[%s212_s4] ss:$8 sps:$4 sm:$0xff] (!%p204_p7)   ;;  %v475_v13 = vld [vmem:[%s212_s4 + $0x14] ss:$8 sps:$4 sm:$0xff] (!%p204_p7)  }
  0x20   : > { %313 = vmatprep.subr.bf16.mxu0 (!%p204_p7), %v472_v11  ;;  %v477_v14 = vld [vmem:[%s212_s4 + $0x10] ss:$8 sps:$4 sm:$0xff] (!%p204_p7)   ;;  %v478_v15 = vld [vmem:[%s212_s4 + $0x24] ss:$8 sps:$4 sm:$0xff] (!%p204_p7)   ;;  %v480_v16 = vld [vmem:[%s212_s4 + $0x20] ss:$8 sps:$4 sm:$0xff] (!%p204_p7)  }
  0x21   : > { %314 = vmatpush1.bf16.msra.mxu0 (!%p204_p7), %v474_v12  ;;  %v481_v17 = vld [vmem:[%s212_s4 + $0x34] ss:$8 sps:$4 sm:$0xff] (!%p204_p7)   ;;  %v250_v18 = vld [vmem:[%s212_s4 + $0x40] sm:$0xff] (!%p204_p7)  ;;  %v483_v19 = vld [vmem:[%s212_s4 + $0x30] ss:$8 sps:$4 sm:$0xff] (!%p204_p7)  }
  0x22   : > { %315 = vmatprep.subr.bf16.mxu0 %v475_v13  ;;  %v438_v20 = vcombine.high %v250_v18, %v250_v18  ;;  %v437_v21 = vcombine.low %v250_v18, %v250_v18  ;;  %s597_s7 = smov (!%p235_p8, %s427_s7), 3 }
  0x23   : > { %s428_s8 = sshll.u32 %s597_s7, 3 }
  0x24   : > { %v308_v22 = vsel %vm306_vm0, %v437_v21, 0  ;;  %s238_s11 = scalar_lea.vmem %s592_s3, %s428_s8 }
  0x25   : > { %316 = vmatpush1.bf16.msra.mxu0 %v477_v14 }
  0x26   : > { %317 = vmatprep.subr.bf16.mxu0 %v478_v15 }
  0x29   : > { %318 = vmatpush1.bf16.msra.mxu0 %v480_v16 }
  0x2a   : > { %319 = vmatprep.subr.bf16.mxu0 %v481_v17 }
  0x2d   : > { %320 = vmatpush1.bf16.msra.mxu0 %v483_v19 }
  0x2e   : > { %439 = vmatprep.subr.msk.bf16.mxu0 %vm306_vm0, %v438_v20 }
  0x31   : > { %322 = vmatpush1.bf16.msra.mxu0 %v308_v22 }
  0x34   : > { %440 = vmatmul.mubr.msk.bf16.vlgmr.msra.gmra.mrb[0].mxu0 %vm302_vm1, %v241_v23 }
  0x9b   : > { %v255_v24 = vpop.permute.xlu0 %254 }
 0x107   : > { %v347_v25 = vpop.f32.mrb[0].mxu0 }
 0x108   : > { %v348_v26 = vadd.f32 %v347_v25, %v255_v24  ;;  %v349_v27 = vpop.f32.mrb[1].mxu0 }
 0x109   : > { %v350_v28 = vadd.f32 %v349_v27, %v255_v24  ;;  %v351_v29 = vpop.f32.mrb[2].mxu0 }
 0x10a   : > { %v354_v30 = vmax.f32 %v348_v26, 0.0  ;;  %v352_v31 = vpop.f32.mrb[3].mxu0 }
 0x10b   : > { %v355_v32 = vmax.f32 %v350_v28, 0.0 }
 0x10c   : > { %356 = vst [vmem:[%s238_s11] sm:$0xff] %v354_v30 }
 0x10d   : > { %357 = vst [vmem:[%s238_s11 + $0x8] sm:$0xff] %v355_v32 }
 0x10e PF: > { %p10_p9 = scmp.ge.s32.totalorder %s548_s16, 4   ;;  %s593_s12 = smov %s504_s13 }
 0x10f   : > { %s594_s13 = smov %s557_s19  ;;  %s595_s14 = smov %s548_s16 }
 0x110   :  { %12 = sbr.rel (!%p10_p9) target bundleno = 2 (0x2), region = 105 }

// kernel: simnet_cnn_allsize_ver4_forward.5
= control target key start
LH: loop header
LB: loop body
LE: loop exit
PB: predicated region body
PF: predicated region fallthrough
CT: control target
= control target key end

     0   :  { %v1098_v43 = vmov 1983009808   ;;  %v182_v45 = vlaneseq  ;;  %s1623_s0 = inlined_call_operand.vmem [shape: f32[2,1152], index: 0, kind: input, shape index: {}]   ;;  %s1624_s1 = inlined_call_operand.vmem [shape: f32[1152,32], index: 1, kind: input, shape index: {}]   ;;  %s1625_s2 = inlined_call_operand.vmem [shape: f32[1,32], index: 2, kind: input, shape index: {}]   ;;  %s1626_s3 = inlined_call_operand.vmem [shape: f32[32,10], index: 3, kind: input, shape index: {}]   ;;  %s1627_s4 = inlined_call_operand.vmem [shape: f32[1,10], index: 4, kind: input, shape index: {}]   ;;  %s1628_s5 = inlined_call_operand.hbm [shape: f32[2,10], index: 5, kind: output, shape index: {}]  }
   0x1   :  { %v40_v0 = vld [vmem:[%s1624_s1 + $0x80] sm:$0xff]  ;;  %v41_v1 = vld [vmem:[%s1624_s1 + $0x88] sm:$0xff]  ;;  %v42_v11 = vld [vmem:[%s1624_s1 + $0x90] sm:$0xff]  ;;  %v180_v44 = vunpack.c.l.s4 %v1098_v43 }
   0x2   :  { %v24_v2 = vld [vmem:[%s1624_s1] sm:$0xff]  ;;  %v905_v3 = vpack.c.bf16 %v41_v1, %v40_v0  ;;  %v25_v4 = vld [vmem:[%s1624_s1 + $0x8] sm:$0xff]  ;;  %v43_v13 = vld [vmem:[%s1624_s1 + $0x98] sm:$0xff]  ;;  %v183_v60 = vshrl.u32 %v182_v45, 7 }
   0x3   :  { %v72_v5 = vld [vmem:[%s1624_s1 + $0x180] sm:$0xff]  ;;  %v73_v6 = vld [vmem:[%s1624_s1 + $0x188] sm:$0xff]  ;;  %v907_v7 = vpack.c.bf16 %v25_v4, %v24_v2  ;;  %v26_v14 = vld [vmem:[%s1624_s1 + $0x10] sm:$0xff]  ;;  %v909_v16 = vpack.c.bf16 %v43_v13, %v42_v11  ;;  %v181_v59 = vunpack.c.0.s8 %v180_v44 }
   0x4   :  { %v937_v8 = vpack.c.bf16 %v73_v6, %v72_v5  ;;  %v56_v9 = vld [vmem:[%s1624_s1 + $0x100] sm:$0xff]  ;;  %v57_v10 = vld [vmem:[%s1624_s1 + $0x108] sm:$0xff]  ;;  %906 = vmatprep.subr.bf16.mxu0 %v905_v3  ;;  %v27_v15 = vld [vmem:[%s1624_s1 + $0x18] sm:$0xff] }
   0x5   :  { %v939_v12 = vpack.c.bf16 %v57_v10, %v56_v9  ;;  %908 = vmatpush3.bf16.msra.mxu0 %v907_v7  ;;  %v911_v17 = vpack.c.bf16 %v27_v15, %v26_v14  ;;  %v74_v18 = vld [vmem:[%s1624_s1 + $0x190] sm:$0xff]  ;;  %v75_v19 = vld [vmem:[%s1624_s1 + $0x198] sm:$0xff]  ;;  %v44_v23 = vld [vmem:[%s1624_s1 + $0xa0] sm:$0xff]  ;;  %v1277_v10 = vsub.s32 %v181_v59, %v183_v60 }
   0x6   :  { %938 = vmatprep.subr.bf16.mxu1 %v937_v8  ;;  %v58_v20 = vld [vmem:[%s1624_s1 + $0x110] sm:$0xff]  ;;  %v941_v21 = vpack.c.bf16 %v75_v19, %v74_v18  ;;  %v59_v22 = vld [vmem:[%s1624_s1 + $0x118] sm:$0xff]  ;;  %v45_v24 = vld [vmem:[%s1624_s1 + $0xa8] sm:$0xff]  ;;  %910 = vmatprep.subr.bf16.mxu0 %v909_v16 }
   0x7   :  { %940 = vmatpush3.bf16.msra.mxu1 %v939_v12  ;;  %v943_v25 = vpack.c.bf16 %v59_v22, %v58_v20  ;;  %v913_v26 = vpack.c.bf16 %v45_v24, %v44_v23  ;;  %v28_v27 = vld [vmem:[%s1624_s1 + $0x20] sm:$0xff]  ;;  %v29_v28 = vld [vmem:[%s1624_s1 + $0x28] sm:$0xff]  ;;  %v46_v35 = vld [vmem:[%s1624_s1 + $0xb0] sm:$0xff] }
   0x8   :  { %v76_v29 = vld [vmem:[%s1624_s1 + $0x1a0] sm:$0xff]  ;;  %942 = vmatprep.subr.bf16.mxu1 %v941_v21  ;;  %v77_v30 = vld [vmem:[%s1624_s1 + $0x1a8] sm:$0xff]  ;;  %v915_v33 = vpack.c.bf16 %v29_v28, %v28_v27  ;;  %v47_v36 = vld [vmem:[%s1624_s1 + $0xb8] sm:$0xff] }
   0x9   :  { %v60_v31 = vld [vmem:[%s1624_s1 + $0x120] sm:$0xff]  ;;  %v61_v32 = vld [vmem:[%s1624_s1 + $0x128] sm:$0xff]  ;;  %912 = vmatpush3.bf16.msra.mxu0 %v911_v17  ;;  %v945_v34 = vpack.c.bf16 %v77_v30, %v76_v29  ;;  %v30_v37 = vld [vmem:[%s1624_s1 + $0x30] sm:$0xff]  ;;  %v917_v39 = vpack.c.bf16 %v47_v36, %v46_v35 }
   0xa   :  { %914 = vmatprep.subr.bf16.mxu0 %v913_v26  ;;  %v947_v38 = vpack.c.bf16 %v61_v32, %v60_v31  ;;  %v31_v40 = vld [vmem:[%s1624_s1 + $0x38] sm:$0xff]  ;;  %v78_v41 = vld [vmem:[%s1624_s1 + $0x1b0] sm:$0xff]  ;;  %v48_v49 = vld [vmem:[%s1624_s1 + $0xc0] sm:$0xff] }
   0xb   :  { %944 = vmatpush3.bf16.msra.mxu1 %v943_v25  ;;  %v79_v42 = vld [vmem:[%s1624_s1 + $0x1b8] sm:$0xff]  ;;  %v62_v47 = vld [vmem:[%s1624_s1 + $0x130] sm:$0xff]  ;;  %v49_v50 = vld [vmem:[%s1624_s1 + $0xc8] sm:$0xff]  ;;  %v919_v51 = vpack.c.bf16 %v31_v40, %v30_v37 }
   0xc   :  { %946 = vmatprep.subr.bf16.mxu1 %v945_v34  ;;  %v949_v46 = vpack.c.bf16 %v79_v42, %v78_v41  ;;  %v63_v48 = vld [vmem:[%s1624_s1 + $0x138] sm:$0xff]  ;;  %v80_v52 = vld [vmem:[%s1624_s1 + $0x1c0] sm:$0xff]  ;;  %v81_v53 = vld [vmem:[%s1624_s1 + $0x1c8] sm:$0xff]  ;;  %v921_v55 = vpack.c.bf16 %v49_v50, %v48_v49 }
   0xd   :  { %916 = vmatpush3.bf16.msra.mxu0 %v915_v33  ;;  %v951_v54 = vpack.c.bf16 %v63_v48, %v62_v47  ;;  %v32_v56 = vld [vmem:[%s1624_s1 + $0x40] sm:$0xff]  ;;  %v33_v57 = vld [vmem:[%s1624_s1 + $0x48] sm:$0xff]  ;;  %v953_v61 = vpack.c.bf16 %v81_v53, %v80_v52  ;;  %v50_v63 = vld [vmem:[%s1624_s1 + $0xd0] sm:$0xff] }
   0xe   :  { %918 = vmatprep.subr.bf16.mxu0 %v917_v39  ;;  %v64_v58 = vld [vmem:[%s1624_s1 + $0x140] sm:$0xff]  ;;  %v65_v62 = vld [vmem:[%s1624_s1 + $0x148] sm:$0xff]  ;;  %v51_v0 = vld [vmem:[%s1624_s1 + $0xd8] sm:$0xff]  ;;  %v923_v3 = vpack.c.bf16 %v33_v57, %v32_v56 }
   0xf   :  { %948 = vmatpush3.bf16.msra.mxu1 %v947_v38  ;;  %v82_v1 = vld [vmem:[%s1624_s1 + $0x1d0] sm:$0xff]  ;;  %v83_v2 = vld [vmem:[%s1624_s1 + $0x1d8] sm:$0xff]  ;;  %v955_v5 = vpack.c.bf16 %v65_v62, %v64_v58  ;;  %v925_v6 = vpack.c.bf16 %v51_v0, %v50_v63  ;;  %v52_v12 = vld [vmem:[%s1624_s1 + $0xe0] sm:$0xff] }
  0x10   :  { %950 = vmatprep.subr.bf16.mxu1 %v949_v46  ;;  %v34_v4 = vld [vmem:[%s1624_s1 + $0x50] sm:$0xff]  ;;  %v35_v7 = vld [vmem:[%s1624_s1 + $0x58] sm:$0xff]  ;;  %v957_v11 = vpack.c.bf16 %v83_v2, %v82_v1  ;;  %v53_v13 = vld [vmem:[%s1624_s1 + $0xe8] sm:$0xff] }
  0x11   :  { %920 = vmatpush3.bf16.msra.mxu0 %v919_v51  ;;  %v66_v8 = vld [vmem:[%s1624_s1 + $0x150] sm:$0xff]  ;;  %v67_v9 = vld [vmem:[%s1624_s1 + $0x158] sm:$0xff]  ;;  %v84_v14 = vld [vmem:[%s1624_s1 + $0x1e0] sm:$0xff]  ;;  %v927_v16 = vpack.c.bf16 %v35_v7, %v34_v4  ;;  %v929_v19 = vpack.c.bf16 %v53_v13, %v52_v12 }
  0x12   :  { %922 = vmatprep.subr.bf16.mxu0 %v921_v55  ;;  %v85_v15 = vld [vmem:[%s1624_s1 + $0x1e8] sm:$0xff]  ;;  %v959_v17 = vpack.c.bf16 %v67_v9, %v66_v8  ;;  %v21_v18 = vld [vmem:[%s1623_s0] sm:$0xff]  ;;  %v54_v27 = vld [vmem:[%s1624_s1 + $0xf0] sm:$0xff] }
  0x13   :  { %952 = vmatpush3.bf16.msra.mxu1 %v951_v54  ;;  %v36_v20 = vld [vmem:[%s1624_s1 + $0x60] sm:$0xff]  ;;  %v37_v21 = vld [vmem:[%s1624_s1 + $0x68] sm:$0xff]  ;;  %v185_v23 = vrot.slane %v21_v18, %v1277_v10  ;;  %v178_v24 = vcombine.high %v21_v18, %v21_v18  ;;  %v961_v25 = vpack.c.bf16 %v85_v15, %v84_v14  ;;  %v55_v28 = vld [vmem:[%s1624_s1 + $0xf8] sm:$0xff] }
  0x14   :  { %954 = vmatprep.subr.bf16.mxu1 %v953_v61  ;;  %v68_v22 = vld [vmem:[%s1624_s1 + $0x160] sm:$0xff]  ;;  %v69_v26 = vld [vmem:[%s1624_s1 + $0x168] sm:$0xff]  ;;  %v86_v29 = vld [vmem:[%s1624_s1 + $0x1f0] sm:$0xff]  ;;  %v931_v33 = vpack.c.bf16 %v37_v21, %v36_v20  ;;  %v933_v35 = vpack.c.bf16 %v55_v28, %v54_v27 }
  0x15   :  { %924 = vmatpush3.bf16.msra.mxu0 %v923_v3  ;;  %v87_v30 = vld [vmem:[%s1624_s1 + $0x1f8] sm:$0xff]  ;;  %v193_v31 = vcombine.high %v185_v23, %v185_v23  ;;  %v192_v32 = vrot.slane %v178_v24, %v1277_v10  ;;  %v963_v34 = vpack.c.bf16 %v69_v26, %v68_v22  ;;  %v38_v36 = vld [vmem:[%s1624_s1 + $0x70] sm:$0xff]  ;;  %v104_v42 = vld [vmem:[%s1624_s1 + $0x280] sm:$0xff] }
  0x16   :  { %926 = vmatprep.subr.bf16.mxu0 %v925_v6  ;;  %v39_v37 = vld [vmem:[%s1624_s1 + $0x78] sm:$0xff]  ;;  %v70_v38 = vld [vmem:[%s1624_s1 + $0x170] sm:$0xff]  ;;  %v965_v40 = vpack.c.bf16 %v87_v30, %v86_v29  ;;  %v105_v43 = vld [vmem:[%s1624_s1 + $0x288] sm:$0xff] }
  0x17   :  { %956 = vmatpush3.bf16.msra.mxu1 %v955_v5  ;;  %v194_v39 = vcombine.high %v192_v32, %v192_v32  ;;  %292 = vmatprep.mubr.f32.mxu0 %v193_v31  ;;  %v71_v41 = vld [vmem:[%s1624_s1 + $0x178] sm:$0xff]  ;;  %v136_v44 = vld [vmem:[%s1624_s1 + $0x380] sm:$0xff]  ;;  %v137_v45 = vld [vmem:[%s1624_s1 + $0x388] sm:$0xff]  ;;  %v935_v46 = vpack.c.bf16 %v39_v37, %v38_v36  ;;  %v969_v48 = vpack.c.bf16 %v105_v43, %v104_v42 }
  0x18   :  { %958 = vmatprep.subr.bf16.mxu1 %v957_v11  ;;  %v967_v47 = vpack.c.bf16 %v71_v41, %v70_v38  ;;  %v88_v49 = vld [vmem:[%s1624_s1 + $0x200] sm:$0xff]  ;;  %v89_v50 = vld [vmem:[%s1624_s1 + $0x208] sm:$0xff]  ;;  %v1001_v52 = vpack.c.bf16 %v137_v45, %v136_v44  ;;  %v106_v54 = vld [vmem:[%s1624_s1 + $0x290] sm:$0xff] }
  0x19   :  { %928 = vmatpush3.bf16.msra.mxu0 %v927_v16  ;;  %362 = vmatprep.mubr.f32.mxu1 %v194_v39  ;;  %v120_v51 = vld [vmem:[%s1624_s1 + $0x300] sm:$0xff]  ;;  %v121_v53 = vld [vmem:[%s1624_s1 + $0x308] sm:$0xff]  ;;  %v107_v55 = vld [vmem:[%s1624_s1 + $0x298] sm:$0xff]  ;;  %v971_v58 = vpack.c.bf16 %v89_v50, %v88_v49 }
  0x1a   :  { %930 = vmatprep.subr.bf16.mxu0 %v929_v19  ;;  %v138_v56 = vld [vmem:[%s1624_s1 + $0x390] sm:$0xff]  ;;  %v139_v57 = vld [vmem:[%s1624_s1 + $0x398] sm:$0xff]  ;;  %v1003_v59 = vpack.c.bf16 %v121_v53, %v120_v51  ;;  %v973_v60 = vpack.c.bf16 %v107_v55, %v106_v54  ;;  %v108_v2 = vld [vmem:[%s1624_s1 + $0x2a0] sm:$0xff] }
  0x1b   :  { %960 = vmatpush3.bf16.msra.mxu1 %v959_v17  ;;  %v90_v61 = vld [vmem:[%s1624_s1 + $0x210] sm:$0xff]  ;;  %v91_v62 = vld [vmem:[%s1624_s1 + $0x218] sm:$0xff]  ;;  %v1005_v0 = vpack.c.bf16 %v139_v57, %v138_v56  ;;  %v109_v3 = vld [vmem:[%s1624_s1 + $0x2a8] sm:$0xff] }
  0x1c   :  { %962 = vmatprep.subr.bf16.mxu1 %v961_v25  ;;  %v122_v63 = vld [vmem:[%s1624_s1 + $0x310] sm:$0xff]  ;;  %v123_v1 = vld [vmem:[%s1624_s1 + $0x318] sm:$0xff]  ;;  %v140_v4 = vld [vmem:[%s1624_s1 + $0x3a0] sm:$0xff]  ;;  %v975_v6 = vpack.c.bf16 %v91_v62, %v90_v61  ;;  %v977_v8 = vpack.c.bf16 %v109_v3, %v108_v2 }
  0x1d   :  { %932 = vmatpush3.bf16.msra.mxu0 %v931_v33  ;;  %v141_v5 = vld [vmem:[%s1624_s1 + $0x3a8] sm:$0xff]  ;;  %v1007_v7 = vpack.c.bf16 %v123_v1, %v122_v63  ;;  %v92_v9 = vld [vmem:[%s1624_s1 + $0x220] sm:$0xff]  ;;  %v110_v15 = vld [vmem:[%s1624_s1 + $0x2b0] sm:$0xff] }
  0x1e   :  { %934 = vmatprep.subr.bf16.mxu0 %v933_v35  ;;  %v93_v11 = vld [vmem:[%s1624_s1 + $0x228] sm:$0xff]  ;;  %v124_v12 = vld [vmem:[%s1624_s1 + $0x320] sm:$0xff]  ;;  %v1009_v13 = vpack.c.bf16 %v141_v5, %v140_v4  ;;  %v111_v16 = vld [vmem:[%s1624_s1 + $0x2b8] sm:$0xff] }
  0x1f   :  { %964 = vmatpush3.bf16.msra.mxu1 %v963_v34  ;;  %v125_v14 = vld [vmem:[%s1624_s1 + $0x328] sm:$0xff]  ;;  %v142_v17 = vld [vmem:[%s1624_s1 + $0x3b0] sm:$0xff]  ;;  %v143_v18 = vld [vmem:[%s1624_s1 + $0x3b8] sm:$0xff]  ;;  %v979_v19 = vpack.c.bf16 %v93_v11, %v92_v9  ;;  %v981_v22 = vpack.c.bf16 %v111_v16, %v110_v15 }
  0x20   :  { %966 = vmatprep.subr.bf16.mxu1 %v965_v40  ;;  %v94_v20 = vld [vmem:[%s1624_s1 + $0x230] sm:$0xff]  ;;  %v1011_v21 = vpack.c.bf16 %v125_v14, %v124_v12  ;;  %v127_v25 = vld [vmem:[%s1624_s1 + $0x338] sm:$0xff]  ;;  %v1013_v26 = vpack.c.bf16 %v143_v18, %v142_v17  ;;  %v112_v27 = vld [vmem:[%s1624_s1 + $0x2c0] sm:$0xff] }
  0x21   :  { %936 = vmatpush3.bf16.msra.mxu0 %v935_v46  ;;  %v126_v24 = vld [vmem:[%s1624_s1 + $0x330] sm:$0xff]  ;;  %v113_v28 = vld [vmem:[%s1624_s1 + $0x2c8] sm:$0xff]  ;;  %v144_v30 = vld [vmem:[%s1624_s1 + $0x3c0] sm:$0xff] }
  0x22   :  { %970 = vmatprep.subr.bf16.mxu0 %v969_v48  ;;  %v22_v29 = vld [vmem:[%s1623_s0 + $0x8] sm:$0xff]  ;;  %v1015_v35 = vpack.c.bf16 %v127_v25, %v126_v24  ;;  %v985_v36 = vpack.c.bf16 %v113_v28, %v112_v27  ;;  %v96_v37 = vld [vmem:[%s1624_s1 + $0x240] sm:$0xff]  ;;  %v114_v44 = vld [vmem:[%s1624_s1 + $0x2d0] sm:$0xff] }
  0x23   :  { %968 = vmatpush3.bf16.msra.mxu1 %v967_v47  ;;  %v145_v31 = vld [vmem:[%s1624_s1 + $0x3c8] sm:$0xff]  ;;  %v195_v33 = vcombine.high %v22_v29, %v22_v29  ;;  %v128_v39 = vld [vmem:[%s1624_s1 + $0x340] sm:$0xff]  ;;  %v115_v45 = vld [vmem:[%s1624_s1 + $0x2d8] sm:$0xff] }
  0x24   :  { %1002 = vmatprep.subr.bf16.mxu1 %v1001_v52  ;;  %293 = vmatmul.mubr.f32.vlgmr.msra.gmra.mrb[0].mxu0 %v185_v23  ;;  %v95_v23 = vld [vmem:[%s1624_s1 + $0x238] sm:$0xff]  ;;  %v97_v38 = vld [vmem:[%s1624_s1 + $0x248] sm:$0xff]  ;;  %v1017_v42 = vpack.c.bf16 %v145_v31, %v144_v30  ;;  %v146_v46 = vld [vmem:[%s1624_s1 + $0x3d0] sm:$0xff]  ;;  %v989_v51 = vpack.c.bf16 %v115_v45, %v114_v44 }
  0x25   :  { %972 = vmatpush3.bf16.msra.mxu0 %v971_v58  ;;  %v983_v34 = vpack.c.bf16 %v95_v23, %v94_v20  ;;  %v1458_v41 = vrot.slane %v195_v33, %v1277_v10  ;;  %v129_v43 = vld [vmem:[%s1624_s1 + $0x348] sm:$0xff]  ;;  %v987_v48 = vpack.c.bf16 %v97_v38, %v96_v37  ;;  %v98_v49 = vld [vmem:[%s1624_s1 + $0x250] sm:$0xff]  ;;  %v99_v52 = vld [vmem:[%s1624_s1 + $0x258] sm:$0xff] }
  0x26   :  { %363 = vmatmul.mubr.f32.vlgmr.msra.gmra.mrb[0].mxu1 %v192_v32  ;;  %974 = vmatprep.subr.bf16.mxu0 %v973_v60  ;;  %v1444_v32 = vrot.slane %v22_v29, %v1277_v10  ;;  %v147_v10 = vld [vmem:[%s1624_s1 + $0x3d8] sm:$0xff]  ;;  %v1019_v50 = vpack.c.bf16 %v129_v43, %v128_v39  ;;  %v130_v53 = vld [vmem:[%s1624_s1 + $0x350] sm:$0xff] }
  0x27   :  { %1004 = vmatpush3.bf16.msra.mxu1 %v1003_v59  ;;  %v211_v47 = vcombine.high %v1458_v41, %v1458_v41 }
  0x28   :  { %1006 = vmatprep.subr.bf16.mxu1 %v1005_v0  ;;  %v210_v40 = vcombine.high %v1444_v32, %v1444_v32 }
  0x29   :  { %976 = vmatpush3.bf16.msra.mxu0 %v975_v6 }
  0x2a   :  { %978 = vmatprep.subr.bf16.mxu0 %v977_v8  ;;  %432 = vmatprep.mubr.f32.mxu0 %v210_v40 }
  0x2b   :  { %1008 = vmatpush3.bf16.msra.mxu1 %v1007_v7 }
  0x2c   :  { %1010 = vmatprep.subr.bf16.mxu1 %v1009_v13 }
  0x2d   :  { %980 = vmatpush3.bf16.msra.mxu0 %v979_v19 }
  0x2e   :  { %982 = vmatprep.subr.bf16.mxu0 %v981_v22 }
  0x2f   :  { %1012 = vmatpush3.bf16.msra.mxu1 %v1011_v21 }
  0x30   :  { %1014 = vmatprep.subr.bf16.mxu1 %v1013_v26 }
  0x31   :  { %984 = vmatpush3.bf16.msra.mxu0 %v983_v34 }
  0x32   :  { %986 = vmatprep.subr.bf16.mxu0 %v985_v36 }
  0x33   :  { %1016 = vmatpush3.bf16.msra.mxu1 %v1015_v35 }
  0x34   :  { %10 = vsyncpa [#allocation3], 0  ;;  %1018 = vmatprep.subr.bf16.mxu1 %v1017_v42  ;;  %v1021_v54 = vpack.c.bf16 %v147_v10, %v146_v46  ;;  %v131_v55 = vld [vmem:[%s1624_s1 + $0x358] sm:$0xff]  ;;  %v116_v56 = vld [vmem:[%s1624_s1 + $0x2e0] sm:$0xff]  ;;  %502 = vmatprep.mubr.f32.mxu1 %v211_v47  ;;  %v991_v60 = vpack.c.bf16 %v99_v52, %v98_v49  ;;  %v1099_v22 = vmov 0.0|0.0   ;;  %vm1100_vm0 = vmmov 0  }
  0x35   :  { %v117_v57 = vld [vmem:[%s1624_s1 + $0x2e8] sm:$0xff]  ;;  %v148_v58 = vld [vmem:[%s1624_s1 + $0x3e0] sm:$0xff]  ;;  %988 = vmatpush3.bf16.msra.mxu0 %v987_v48  ;;  %v1023_v61 = vpack.c.bf16 %v131_v55, %v130_v53  ;;  %v118_v4 = vld [vmem:[%s1624_s1 + $0x2f0] sm:$0xff]  ;;  %v1101_v28 = vmov 0.0   ;;  %vm590_vm1 = vcmask 261120   ;;  %vm664_vm2 = vcmask 74752  }
  0x36   :  { %v149_v59 = vld [vmem:[%s1624_s1 + $0x3e8] sm:$0xff]  ;;  %990 = vmatprep.subr.bf16.mxu0 %v989_v51  ;;  %v993_v62 = vpack.c.bf16 %v117_v57, %v116_v56  ;;  %v100_v63 = vld [vmem:[%s1624_s1 + $0x260] sm:$0xff]  ;;  %v119_v5 = vld [vmem:[%s1624_s1 + $0x2f8] sm:$0xff] }
  0x37   :  { %1020 = vmatpush3.bf16.msra.mxu1 %v1019_v50  ;;  %v101_v0 = vld [vmem:[%s1624_s1 + $0x268] sm:$0xff]  ;;  %v132_v1 = vld [vmem:[%s1624_s1 + $0x360] sm:$0xff]  ;;  %v1025_v2 = vpack.c.bf16 %v149_v59, %v148_v58  ;;  %v150_v6 = vld [vmem:[%s1624_s1 + $0x3f0] sm:$0xff]  ;;  %v997_v11 = vpack.c.bf16 %v119_v5, %v118_v4 }
  0x38   :  { %1022 = vmatprep.subr.bf16.mxu1 %v1021_v54  ;;  %v133_v3 = vld [vmem:[%s1624_s1 + $0x368] sm:$0xff]  ;;  %v151_v7 = vld [vmem:[%s1624_s1 + $0x3f8] sm:$0xff]  ;;  %v995_v8 = vpack.c.bf16 %v101_v0, %v100_v63  ;;  %v102_v12 = vld [vmem:[%s1624_s1 + $0x270] sm:$0xff] }
  0x39   :  { %992 = vmatpush3.bf16.msra.mxu0 %v991_v60  ;;  %v1027_v9 = vpack.c.bf16 %v133_v3, %v132_v1  ;;  %v103_v13 = vld [vmem:[%s1624_s1 + $0x278] sm:$0xff]  ;;  %v1029_v14 = vpack.c.bf16 %v151_v7, %v150_v6  ;;  %v134_v15 = vld [vmem:[%s1624_s1 + $0x370] sm:$0xff]  ;;  %v152_v19 = vld [vmem:[%s1624_s1 + $0x400] sm:$0xff] }
  0x3a   :  { %994 = vmatprep.subr.bf16.mxu0 %v993_v62  ;;  %v135_v16 = vld [vmem:[%s1624_s1 + $0x378] sm:$0xff]  ;;  %v999_v17 = vpack.c.bf16 %v103_v13, %v102_v12  ;;  %v153_v20 = vld [vmem:[%s1624_s1 + $0x408] sm:$0xff]  ;;  %v154_v23 = vld [vmem:[%s1624_s1 + $0x410] sm:$0xff] }
  0x3b   :  { %1024 = vmatpush3.bf16.msra.mxu1 %v1023_v61  ;;  %v1031_v18 = vpack.c.bf16 %v135_v16, %v134_v15  ;;  %v1034_v21 = vpack.c.bf16 %v153_v20, %v152_v19  ;;  %v155_v24 = vld [vmem:[%s1624_s1 + $0x418] sm:$0xff]  ;;  %v156_v26 = vld [vmem:[%s1624_s1 + $0x420] sm:$0xff]  ;;  %v157_v27 = vld [vmem:[%s1624_s1 + $0x428] sm:$0xff] }
  0x3c   :  { %1026 = vmatprep.subr.bf16.mxu1 %v1025_v2  ;;  %v1037_v25 = vpack.c.bf16 %v155_v24, %v154_v23  ;;  %v1040_v29 = vpack.c.bf16 %v157_v27, %v156_v26  ;;  %v158_v30 = vld [vmem:[%s1624_s1 + $0x430] sm:$0xff]  ;;  %v159_v31 = vld [vmem:[%s1624_s1 + $0x438] sm:$0xff]  ;;  %v160_v33 = vld [vmem:[%s1624_s1 + $0x440] sm:$0xff] }
  0x3d   :  { %996 = vmatpush3.bf16.msra.mxu0 %v995_v8  ;;  %v161_v34 = vld [vmem:[%s1624_s1 + $0x448] sm:$0xff]  ;;  %v162_v36 = vld [vmem:[%s1624_s1 + $0x450] sm:$0xff]  ;;  %v163_v37 = vld [vmem:[%s1624_s1 + $0x458] sm:$0xff] }
  0x3e   :  { %998 = vmatprep.subr.bf16.mxu0 %v997_v11  ;;  %v1046_v35 = vpack.c.bf16 %v161_v34, %v160_v33  ;;  %v1049_v38 = vpack.c.bf16 %v163_v37, %v162_v36  ;;  %v164_v39 = vld [vmem:[%s1624_s1 + $0x460] sm:$0xff]  ;;  %v165_v40 = vld [vmem:[%s1624_s1 + $0x468] sm:$0xff]  ;;  %v166_v42 = vld [vmem:[%s1624_s1 + $0x470] sm:$0xff] }
  0x3f   :  { %1028 = vmatpush3.bf16.msra.mxu1 %v1027_v9  ;;  %v167_v43 = vld [vmem:[%s1624_s1 + $0x478] sm:$0xff]  ;;  %v694_v45 = vld.sshfl [vmem:[%s1623_s0 + $0x10] sm:$0x3 pattern:$0x76325410]  ;;  %v579_v46 = vld [vmem:[%s1626_s3] sm:$0xff] }
  0x40   :  { %1030 = vmatprep.subr.bf16.mxu1 %v1029_v14  ;;  %v1055_v44 = vpack.c.bf16 %v167_v43, %v166_v42  ;;  %v580_v10 = vld [vmem:[%s1626_s3 + $0x8] sm:$0xff]  ;;  %v581_v48 = vld [vmem:[%s1626_s3 + $0x10] sm:$0xff]  ;;  %v582_v49 = vld [vmem:[%s1626_s3 + $0x18] sm:$0xff] }
  0x41   :  { %1000 = vmatpush3.bf16.msra.mxu0 %v999_v17  ;;  %v1058_v47 = vpack.c.bf16 %v580_v10, %v579_v46  ;;  %v1061_v50 = vpack.c.bf16 %v582_v49, %v581_v48  ;;  %v693_v52 = vld [vmem:[%s1625_s2] ss:$0 sm:$0xff] }
  0x42   :  { %1033 = vmatprep.subr.bf16.mxu0 %v1099_v22  ;;  %v695_v8 = vld [vmem:[%s1627_s4] ss:$0 sm:$0xff]  ;;  %s1102_s4 = smov [#allocation2]  }
  0x43   :  { %1032 = vmatpush3.bf16.msra.mxu1 %v1031_v18  ;;  %s685_s20 = sshll.u32 %s1102_s4, 4  ;;  %s686_s20 = int_to_ptr.vmem [resolvable:$true] %s685_s20 }
  0x44   :  { %1057 = vmatprep.subr.bf16.mxu1 %v1099_v22  ;;  %433 = vmatmul.mubr.f32.vlgmr.msra.gmra.mrb[2].mxu0 %v1444_v32  ;;  %v1043_v32 = vpack.c.bf16 %v159_v31, %v158_v30  ;;  %s1074_s21 = scalar_lea.vmem %s686_s20, 32  ;;  %p1079_p1 = scmp.lt.s32.totalorder %s686_s20, %s686_s20 }
  0x45   :  { %1035 = vmatpush3.bf16.msra.mxu0 %v1034_v21  ;;  %891 = vmatprep.mubr.msk.f32.mxu0 %vm1100_vm0, %v1101_v28  ;;  %p1075_p0 = scmp.ne.s32.totalorder %s686_s20, %s1074_s21  ;;  %p1080_p2 = scmp.lt.s32.totalorder %s1074_s21, %s1074_s21 }
  0x46   :  { %503 = vmatmul.mubr.f32.vlgmr.msra.gmra.mrb[2].mxu1 %v1458_v41  ;;  %1036 = vmatprep.subr.bf16.mxu0 %v1099_v22  ;;  %v1052_v41 = vpack.c.bf16 %v165_v40, %v164_v39 }
  0x47   :  { %902 = vmatprep.mubr.msk.f32.mxu1 %vm1100_vm0, %v1101_v28  ;;  %1059 = vmatpush3.bf16.msra.mxu1 %v1058_v47  ;;  %p1081_p3 = por %p1080_p2, %p1079_p1 }
  0x48   :  { %1060 = vmatprep.subr.bf16.mxu1 %v1099_v22 }
  0x49   :  { %1038 = vmatpush3.bf16.msra.mxu0 %v1037_v25  ;;  %p1082_p4 = pnand %p1081_p3, %p1075_p0 }
  0x4a   :  { %1039 = vmatprep.subr.bf16.mxu0 %v1099_v22 }
  0x4b   :  { %1062 = vmatpush3.bf16.msra.mxu1 %v1061_v50 }
  0x4d   :  { %1041 = vmatpush3.bf16.msra.mxu0 %v1040_v29 }
  0x4e   :  { %1042 = vmatprep.subr.bf16.mxu0 %v1099_v22 }
  0x51   :  { %1044 = vmatpush3.bf16.msra.mxu0 %v1043_v32 }
  0x52   :  { %1045 = vmatprep.subr.bf16.mxu0 %v1099_v22 }
  0x55   :  { %1047 = vmatpush3.bf16.msra.mxu0 %v1046_v35 }
  0x56   :  { %1048 = vmatprep.subr.bf16.mxu0 %v1099_v22 }
  0x59   :  { %1050 = vmatpush3.bf16.msra.mxu0 %v1049_v38 }
  0x5a   :  { %1051 = vmatprep.subr.bf16.mxu0 %v1099_v22 }
  0x5d   :  { %1053 = vmatpush3.bf16.msra.mxu0 %v1052_v41 }
  0x5e   :  { %1054 = vmatprep.subr.bf16.mxu0 %v1099_v22 }
  0x61   :  { %1056 = vmatpush3.bf16.msra.mxu0 %v1055_v44 }
  0x64   :  { %892 = vmatmul.mubr.f32.vlgmr.msra.gmra.mrb[4].mxu0 %v694_v45 }
  0xf7   :  { %v729_v51 = vpop.f32.mrb[0].mxu0 }
  0xf8   :  { %v730_v53 = vpop.f32.mrb[1].mxu0 }
  0xf9   :  { %v764_v54 = vpop.f32.mrb[0].mxu1  ;;  %v731_v55 = vadd.f32 %v730_v53, %v729_v51 }
  0xfa   :  { %v765_v56 = vpop.f32.mrb[1].mxu1 }
  0xfb   :  { %v766_v57 = vadd.f32 %v765_v56, %v764_v54  ;;  %v295_v58 = vadd.f32 %v731_v55, %v693_v52 }
  0xfd   :  { %v365_v59 = vadd.f32 %v766_v57, %v295_v58 }
 0x117   :  { %v799_v60 = vpop.f32.mrb[2].mxu0 }
 0x118   :  { %v800_v61 = vpop.f32.mrb[3].mxu0 }
 0x119   :  { %v834_v62 = vpop.f32.mrb[2].mxu1  ;;  %v801_v63 = vadd.f32 %v800_v61, %v799_v60 }
 0x11a   :  { %v835_v0 = vpop.f32.mrb[3].mxu1 }
 0x11b   :  { %v836_v1 = vadd.f32 %v835_v0, %v834_v62  ;;  %v435_v2 = vadd.f32 %v801_v63, %v365_v59 }
 0x11d   :  { %v505_v3 = vadd.f32 %v836_v1, %v435_v2 }
 0x137   :  { %v574_v4 = vpop.f32.mrb[4].mxu0 }
 0x138   :  { %v575_v5 = vadd.f32 %v574_v4, %v505_v3  ;;  %v893_v6 = vpop.f32.mrb[5].mxu0 }
 0x13a   :  { %v578_v7 = vmax.f32 %v575_v5, 0.0 }
 0x13c   :  { %903 = vmatmul.mubr.msk.f32.vlgmr.msra.gmra.mrb[4].mxu1 %vm590_vm1, %v578_v7 }
 0x20f   :  { %v660_v9 = vpop.f32.mrb[4].mxu1 }
 0x210   :  { %v661_v11 = vadd.f32 %v695_v8, %v660_v9  ;;  %v904_v12 = vpop.f32.mrb[5].mxu1 }
 0x212   :  { %v665_v13 = vsel %vm664_vm2, %v661_v11, -inf }
 0x213   :  { %666 = vmax.xlane.f32.xlu0 %v665_v13 }
 0x2a0   :  { %v667_v14 = vpop.xlane.xlu0 %666 }
 0x2a1   :  { %v668_v15 = vsub.f32 %v661_v11, %v667_v14 }
 0x2a3   :  { %v669_v16 = vmul.f32 1.442695, %v668_v15 }
 0x2a5   :  { %1070 = vpow2.f32 %v669_v16 }
 0x2af   :  { %v1071_v17 = vpop.eup %1070 }
 0x2b0   :  { %v671_v18 = vsel %vm664_vm2, %v1071_v17, 0.0 }
 0x2b1   :  { %672 = vadd.xlane.f32.xlu0 %v671_v18 }
 0x33e   :  { %v673_v19 = vpop.xlane.xlu0 %672 }
 0x33f   :  { %1072 = vlog2.f32 %v673_v19 }
 0x349   :  { %v1073_v20 = vpop.eup %1072 }
 0x34a   :  { %v675_v21 = vmul.f32 0.6931472, %v1073_v20 }
 0x34c   :  { %v676_v22 = vadd.f32 %v675_v21, %v667_v14 }
 0x34e   :  { %v677_v23 = vsub.f32 %v661_v11, %v676_v22 }
 0x350   :  { %678 = vst.msk [vmem:[#allocation2] sm:$0x3] %vm664_vm2, %v677_v23 }
 0x351   :  { %1085 = shalt.err (!%p1082_p4)
}
 0x352   :  { %s1086_s24 = scalar_lea.hbm %s1628_s5, 32 }
 0x353   :  { %p1087_p5 = scmp.ne.s32.totalorder %s1628_s5, %s1086_s24  ;;  %p1090_p6 = scmp.lt.u32.totalorder %s1086_s24, %s1628_s5 }
 0x355   :  { %p1092_p7 = pnand %p1090_p6, %p1087_p5 }
 0x357   :  { %1095 = shalt.err (!%p1092_p7)
}
 0x358   :  { %688 = dma.vmem_to_hbm [thread:$0]  %s686_s20, 32, %s1628_s5, [#allocation3]  }
 0x359   :  { %1096 = dma.done.wait [#allocation3], 32  }
 0x35a   :  { %1097 = vsyncadd [#allocation3], 4294967264 }
 0x35b   :  { %692 = vsyncpa [#allocation3], 1 }

</bundles_post_ra>
